<compile_context>
chip_gen: v7x
topology: tpu7x:2x2x1
jax: 0.10.0
libtpu: 0.0.40
codegen_flags: <defaults>
</compile_context>

<pallas_src>
import functools

import jax
import jax.numpy as jnp
import numpy as np
from jax.experimental import pallas as pl
from jax.experimental.pallas import tpu as pltpu


# ----------------------------------------------------------------------------
# Fused kernel: grid = (batch, q_tile); all heads + output head in one pass
# ----------------------------------------------------------------------------
def _fused_mha_kernel(q_ref, k_ref, v_ref, mask_ref, fkt_ref, wv_ref, fcw_ref,
                      fcb_ref, g_ref, beta_ref, out_ref, attn_ref,
                      et_scr, vh_scr, *, n_head, d_v, len_k, compute_dtype):
    qi = pl.program_id(1)

    # ---- per-batch-element precompute, hoisted out of the Lq-tile loop -------
    @pl.when(qi == 0)
    def _():
        kc = k_ref[0].astype(compute_dtype)                     # (Lk, d_model)
        # kp_t[h, j] = k_j . fk_h  (contract both operands on their last dim;
        # same A @ B^T pattern the MXU handles natively).
        kp_t = jax.lax.dot_general(
            fkt_ref[...], kc, (((1,), (1,)), ((), ())),
            preferred_element_type=jnp.float32)                 # (H, Lk)
        # Global (per-head) max shift; softmax is shift-invariant so this matches
        # the reference's per-row masked max up to f32 rounding.
        m = jnp.max(kp_t, axis=1, keepdims=True)                # (H, 1)
        et_scr[...] = jnp.exp(kp_t - m)                         # (H, Lk) f32
        vc = v_ref[0].astype(compute_dtype)                     # (Lk, d_model)
        vh_scr[...] = jnp.dot(vc, wv_ref[...],
                              preferred_element_type=jnp.float32
                              ).astype(vh_scr.dtype)            # (Lk, H*d_v)

    q = q_ref[0]                                                # (tq, d_model) f32
    # Float "keep" multiplier built once per step, reused by all heads.
    keep = 1.0 - mask_ref[0].astype(jnp.float32)                # (tq, Lk)
    inv_lk = jnp.float32(1.0 / len_k)

    acc = jnp.zeros(q.shape, jnp.float32)                       # fused fc accumulator
    for h in range(n_head):                                     # static unroll (H small)
        e_row = et_scr[pl.ds(h, 1), :]                          # (1, Lk)
        em = keep * e_row                                       # (tq, Lk) masked numer.
        s = jnp.sum(em, axis=-1, keepdims=True)                 # (tq, 1)
        s_safe = jnp.where(s > 0.0, s, jnp.float32(1.0))
        inv = pl.reciprocal(s_safe, approx=False)               # tiny vector; keep exact
        # fully-masked rows: reference softmax of an all -1e10 row is uniform 1/Lk
        fallback = jnp.where(s > 0.0, jnp.float32(0.0), inv_lk)  # (tq, 1)
        attn = em * inv + fallback                               # (tq, Lk)
        attn_ref[h, 0] = attn.astype(attn_ref.dtype)
        pv = jnp.dot(attn.astype(compute_dtype),
                     vh_scr[:, pl.ds(h * d_v, d_v)],
                     preferred_element_type=jnp.float32)         # (tq, d_v)
        acc = acc + jnp.dot(pv.astype(compute_dtype),
                            fcw_ref[pl.ds(h * d_v, d_v), :],
                            preferred_element_type=jnp.float32)  # (tq, d_model)

    # fused output head: fc bias -> LeakyReLU(0.2) -> residual -> LayerNorm
    x = acc + fcb_ref[...]
    x = jnp.where(x >= 0.0, x, 0.2 * x)
    x = x + q
    mu = jnp.mean(x, axis=-1, keepdims=True)
    var = jnp.mean(jnp.square(x - mu), axis=-1, keepdims=True)
    y = (x - mu) * jax.lax.rsqrt(var + jnp.float32(1e-5))
    out_ref[0] = (y * g_ref[...] + beta_ref[...]).astype(out_ref.dtype)


# ----------------------------------------------------------------------------
# Wrapper
# ----------------------------------------------------------------------------
def map_based_mha(q, k, v, mask, params, *, n_head, d_k, d_v,
                  compute_dtype=jnp.float32, attn_dtype=jnp.float32):
    sz_b, len_q, d_model = q.shape
    _, len_k, _ = k.shape

    # --- fold / pack weights once, outside the kernel ------------------------
    # score_h(i,j) = (Wq_h q_i).wm[:d_k] + (Wk_h k_j).wm[d_k:]; the q term is a
    # per-row constant, so softmax over j removes it exactly -> Wq never needed.
    wm = params["wm"]                                            # (1, 2*d_k)
    wk3 = params["wk"].reshape(n_head, d_k, d_model)
    fkT = jnp.einsum("k,hkd->hd", wm[0, d_k:], wk3).astype(compute_dtype)  # (H, dm)
    wv_packed = params["wv"].T.astype(compute_dtype)             # (d_model, H*d_v)
    fc_wt = params["fc_w"].T.astype(compute_dtype)               # (H*d_v, d_model)
    fc_b = params["fc_b"].reshape(1, d_model).astype(jnp.float32)
    gamma = params["ln_g"].reshape(1, d_model).astype(jnp.float32)
    beta = params["ln_b"].reshape(1, d_model).astype(jnp.float32)
    mask_i8 = mask.astype(jnp.int8)                              # 4x less DMA than i32

    # --- Lq tiling ------------------------------------------------------------
    tq = len_q
    for cand in (128, 64, 32, 16, 8):
        if len_q % cand == 0:
            tq = cand
            break
    n_qt = len_q // tq

    # --- VMEM budget (input/output blocks are double-buffered by the pipeline) -
    def nbytes(shape, dtype):
        return int(np.prod(shape)) * np.dtype(dtype).itemsize

    cdt = np.dtype(compute_dtype)
    vmem_bytes = 0
    vmem_bytes += 2 * nbytes((1, tq, d_model), np.float32)            # q
    vmem_bytes += 2 * nbytes((1, len_k, d_model), np.float32)         # k
    vmem_bytes += 2 * nbytes((1, len_k, d_model), np.float32)         # v
    vmem_bytes += 2 * nbytes((1, tq, len_k), np.int8)                 # mask
    vmem_bytes += 2 * nbytes((1, tq, d_model), np.float32)            # out
    vmem_bytes += 2 * nbytes((n_head, 1, tq, len_k), attn_dtype)      # attn
    vmem_bytes += 2 * (nbytes((n_head, d_model), cdt)                 # weights
                       + nbytes((d_model, n_head * d_v), cdt)
                       + nbytes((n_head * d_v, d_model), cdt)
                       + 3 * nbytes((1, d_model), np.float32))
    vmem_bytes += nbytes((n_head, len_k), np.float32)                 # exp scratch
    vmem_bytes += nbytes((len_k, n_head * d_v), cdt)                  # V@Wv scratch
    vmem_limit = int(min(max(int(vmem_bytes * 1.5) + (4 << 20), 32 << 20), 128 << 20))

    kernel = functools.partial(_fused_mha_kernel, n_head=n_head, d_v=d_v,
                               len_k=len_k, compute_dtype=compute_dtype)

    out, attn4 = pl.pallas_call(
        kernel,
        out_shape=(
            jax.ShapeDtypeStruct((sz_b, len_q, d_model), jnp.float32),
            jax.ShapeDtypeStruct((n_head, sz_b, len_q, len_k), attn_dtype),
        ),
        grid_spec=pltpu.PrefetchScalarGridSpec(
            num_scalar_prefetch=0,
            grid=(sz_b, n_qt),
            in_specs=[
                pl.BlockSpec((1, tq, d_model), lambda b, i: (b, i, 0)),      # q
                pl.BlockSpec((1, len_k, d_model), lambda b, i: (b, 0, 0)),   # k
                pl.BlockSpec((1, len_k, d_model), lambda b, i: (b, 0, 0)),   # v
                pl.BlockSpec((1, tq, len_k), lambda b, i: (b, i, 0)),        # mask i8
                pl.BlockSpec((n_head, d_model), lambda b, i: (0, 0)),        # fk^T
                pl.BlockSpec((d_model, n_head * d_v), lambda b, i: (0, 0)),  # Wv packed
                pl.BlockSpec((n_head * d_v, d_model), lambda b, i: (0, 0)),  # fc W^T
                pl.BlockSpec((1, d_model), lambda b, i: (0, 0)),             # fc bias
                pl.BlockSpec((1, d_model), lambda b, i: (0, 0)),             # ln gamma
                pl.BlockSpec((1, d_model), lambda b, i: (0, 0)),             # ln beta
            ],
            out_specs=(
                pl.BlockSpec((1, tq, d_model), lambda b, i: (b, i, 0)),
                pl.BlockSpec((n_head, 1, tq, len_k), lambda b, i: (0, b, i, 0)),
            ),
            scratch_shapes=[
                pltpu.VMEM((n_head, len_k), jnp.float32),         # exp(kp - max)
                pltpu.VMEM((len_k, n_head * d_v), compute_dtype), # V @ Wv
            ],
        ),
        compiler_params=pltpu.CompilerParams(
            dimension_semantics=("parallel", "arbitrary"),
            vmem_limit_bytes=vmem_limit),
    )(q, k, v, mask_i8, fkT, wv_packed, fc_wt, fc_b, gamma, beta)

    # (n_head, sz_b, Lq, Lk) -> (n_head*sz_b, Lq, Lk): free reshape, torch view order
    attn = attn4.reshape(n_head * sz_b, len_q, len_k)
    return out, attn


# ----------------------------------------------------------------------------
# Pure-JAX reference (mirrors the PyTorch forward, eval mode)
# ----------------------------------------------------------------------------
def reference(q, k, v, mask, params, *, n_head, d_k, d_v):
    sz_b, len_q, d_model = q.shape
    _, len_k, _ = k.shape
    residual = q
    qh = (q @ params["wq"].T).reshape(sz_b, len_q, n_head, d_k)
    kh = (k @ params["wk"].T).reshape(sz_b, len_k, n_head, d_k)
    vh = (v @ params["wv"].T).reshape(sz_b, len_k, n_head, d_v)
    qh = jnp.transpose(qh, (2, 0, 1, 3)).reshape(-1, len_q, d_k)
    kh = jnp.transpose(kh, (2, 0, 1, 3)).reshape(-1, len_k, d_k)
    vh = jnp.transpose(vh, (2, 0, 1, 3)).reshape(-1, len_k, d_v)
    qe = jnp.broadcast_to(qh[:, :, None, :], (n_head * sz_b, len_q, len_k, d_k))
    ke = jnp.broadcast_to(kh[:, None, :, :], (n_head * sz_b, len_q, len_k, d_k))
    qk = jnp.concatenate([qe, ke], axis=3)
    attn = jnp.squeeze(qk @ params["wm"].T, axis=3)
    mask_rep = jnp.tile(mask, (n_head, 1, 1))
    attn = jnp.where(mask_rep, -1e10, attn)
    attn = jax.nn.softmax(attn, axis=2)
    out = attn @ vh
    out = out.reshape(n_head, sz_b, len_q, d_v)
    out = jnp.transpose(out, (1, 2, 0, 3)).reshape(sz_b, len_q, -1)
    out = out @ params["fc_w"].T + params["fc_b"]
    out = jnp.where(out >= 0, out, 0.2 * out)
    x = out + residual
    mu = jnp.mean(x, axis=-1, keepdims=True)
    var = jnp.mean(jnp.square(x - mu), axis=-1, keepdims=True)
    y = (x - mu) / jnp.sqrt(var + 1e-5) * params["ln_g"] + params["ln_b"]
    return y, attn


if __name__ == "__main__":
    # small shapes consistent with the module
    sz_b, seq, d_model = 2, 8, 32
    n_head, d_k, d_v = 2, 16, 16   # module requires n_head*d_k == n_head*d_v

    key = jax.random.PRNGKey(0)
    ks = jax.random.split(key, 10)
    q = jax.random.normal(ks[0], (sz_b, seq, d_model), jnp.float32)
    k = jax.random.normal(ks[1], (sz_b, seq, d_model), jnp.float32)
    v = jax.random.normal(ks[2], (sz_b, seq, d_model), jnp.float32)
    mask = jax.random.uniform(ks[3], (sz_b, seq, seq)) < 0.2   # bool, True = masked

    xavier = float(np.sqrt(2.0 / (n_head * d_v + d_model)))
    params = {
        "wq": 0.1 * jax.random.normal(ks[4], (n_head * d_k, d_model), jnp.float32),
        "wk": 0.1 * jax.random.normal(ks[5], (n_head * d_k, d_model), jnp.float32),
        "wv": 0.1 * jax.random.normal(ks[6], (n_head * d_k, d_model), jnp.float32),
        "wm": 0.1 * jax.random.normal(ks[7], (1, 2 * d_k), jnp.float32),
        "fc_w": xavier * jax.random.normal(ks[8], (d_model, n_head * d_v), jnp.float32),
        "fc_b": 0.05 * jax.random.normal(ks[9], (d_model,), jnp.float32),
        "ln_g": jnp.ones((d_model,), jnp.float32),
        "ln_b": jnp.zeros((d_model,), jnp.float32),
    }

    out_ref, attn_ref = reference(q, k, v, mask, params,
                                  n_head=n_head, d_k=d_k, d_v=d_v)

    # f32 MXU path: tight agreement with the reference.
    run_f32 = jax.jit(functools.partial(map_based_mha, n_head=n_head, d_k=d_k,
                                        d_v=d_v, compute_dtype=jnp.float32))
    out, attn = run_f32(q, k, v, mask, params)
    jax.block_until_ready((out, attn))
    np.testing.assert_allclose(np.asarray(attn), np.asarray(attn_ref),
                               rtol=1e-4, atol=1e-5)
    np.testing.assert_allclose(np.asarray(out), np.asarray(out_ref),
                               rtol=1e-4, atol=1e-4)

    # bf16 MXU-operand path (MXU-native rate on v5e/v6e/v7x); softmax / LayerNorm
    # elementwise math stays f32, so only bf16 operand rounding widens the error.
    run_bf16 = jax.jit(functools.partial(map_based_mha, n_head=n_head, d_k=d_k,
                                         d_v=d_v, compute_dtype=jnp.bfloat16))
    out_b, attn_b = run_bf16(q, k, v, mask, params)
    jax.block_until_ready((out_b, attn_b))
    np.testing.assert_allclose(np.asarray(attn_b), np.asarray(attn_ref),
                               rtol=2e-2, atol=2e-3)
    np.testing.assert_allclose(np.asarray(out_b), np.asarray(out_ref),
                               rtol=5e-2, atol=5e-2)

    print("KERNEL_OK")
</pallas_src>

<mosaic_0001>
module attributes {stable_mosaic.version = 11 : i64} {
  func.func @_fused_mha_kernel(%arg0: i32, %arg1: i32, %arg2: memref<1x8x32xf32, #tpu.memory_space<vmem>>, %arg3: memref<1x8x32xf32, #tpu.memory_space<vmem>>, %arg4: memref<1x8x32xf32, #tpu.memory_space<vmem>>, %arg5: memref<1x8x8xi8, #tpu.memory_space<vmem>>, %arg6: memref<2x32xf32, #tpu.memory_space<vmem>>, %arg7: memref<32x32xf32, #tpu.memory_space<vmem>>, %arg8: memref<32x32xf32, #tpu.memory_space<vmem>>, %arg9: memref<1x32xf32, #tpu.memory_space<vmem>>, %arg10: memref<1x32xf32, #tpu.memory_space<vmem>>, %arg11: memref<1x32xf32, #tpu.memory_space<vmem>>, %arg12: memref<1x8x32xf32, #tpu.memory_space<vmem>>, %arg13: memref<2x1x8x8xf32, #tpu.memory_space<vmem>>, %arg14: memref<2x8xf32, #tpu.memory_space<vmem>>, %arg15: memref<8x32xf32, #tpu.memory_space<vmem>>) attributes {dimension_semantics = [#tpu.dimension_semantics<parallel>, #tpu.dimension_semantics<arbitrary>], iteration_bounds = array<i64: 2, 1>, scalar_prefetch = 0 : i64, scratch_operands = 2 : i64, tpu.core_type = #tpu.core_type<tc>, window_params = [{transform_indices = @transform_0, window_bounds = array<i64: 1, 8, 32>}, {transform_indices = @transform_1, window_bounds = array<i64: 1, 8, 32>}, {transform_indices = @transform_2, window_bounds = array<i64: 1, 8, 32>}, {transform_indices = @transform_3, window_bounds = array<i64: 1, 8, 8>}, {pipeline_mode = #tpu.pipeline_mode<synchronous>, transform_indices = @transform_4, window_bounds = array<i64: 2, 32>}, {pipeline_mode = #tpu.pipeline_mode<synchronous>, transform_indices = @transform_5, window_bounds = array<i64: 32, 32>}, {pipeline_mode = #tpu.pipeline_mode<synchronous>, transform_indices = @transform_6, window_bounds = array<i64: 32, 32>}, {pipeline_mode = #tpu.pipeline_mode<synchronous>, transform_indices = @transform_7, window_bounds = array<i64: 1, 32>}, {pipeline_mode = #tpu.pipeline_mode<synchronous>, transform_indices = @transform_8, window_bounds = array<i64: 1, 32>}, {pipeline_mode = #tpu.pipeline_mode<synchronous>, transform_indices = @transform_9, window_bounds = array<i64: 1, 32>}, {transform_indices = @transform_10, window_bounds = array<i64: 1, 8, 32>}, {transform_indices = @transform_11, window_bounds = array<i64: 2, 1, 8, 8>}]} {
    %c0_i32 = arith.constant 0 : i32
    %0 = arith.cmpi eq, %arg1, %c0_i32 : i32
    %1 = arith.extui %0 : i1 to i32
    %c0_i32_0 = arith.constant 0 : i32
    %2 = arith.cmpi ne, %1, %c0_i32_0 : i32
    scf.if %2 {
      %c0_57 = arith.constant 0 : index
      %c0_58 = arith.constant 0 : index
      %c0_59 = arith.constant 0 : index
      %101 = vector.load %arg3[%c0_57, %c0_58, %c0_59] : memref<1x8x32xf32, #tpu.memory_space<vmem>>, vector<1x8x32xf32>
      %102 = vector.shape_cast %101 : vector<1x8x32xf32> to vector<8x32xf32>
      %c0_60 = arith.constant 0 : index
      %c0_61 = arith.constant 0 : index
      %103 = vector.load %arg6[%c0_60, %c0_61] : memref<2x32xf32, #tpu.memory_space<vmem>>, vector<2x32xf32>
      %cst_62 = arith.constant dense<0.000000e+00> : vector<2x8xf32>
      %104 = tpu.matmul %103, %102, %cst_62 {dimension_numbers = #tpu.dot_dimension_numbers<[1], [1], [0], [0], [0, 0, 1, 0], [], []>} : vector<2x32xf32>, vector<8x32xf32>, vector<2x8xf32> -> vector<2x8xf32>
      %cst_63 = arith.constant dense<0xFF800000> : vector<2xf32>
      %105 = vector.multi_reduction <maximumf>, %104, %cst_63 [1] : vector<2x8xf32> to vector<2xf32>
      %106 = vector.shape_cast %105 : vector<2xf32> to vector<2x1xf32>
      %107 = vector.broadcast %106 : vector<2x1xf32> to vector<2x8xf32>
      %108 = arith.subf %104, %107 : vector<2x8xf32>
      %109 = math.exp %108 : vector<2x8xf32>
      %c0_64 = arith.constant 0 : index
      %c0_65 = arith.constant 0 : index
      %110 = vector.load %arg14[%c0_64, %c0_65] : memref<2x8xf32, #tpu.memory_space<vmem>>, vector<2x8xf32>
      tpu.vector_store %arg14[%c0_64, %c0_65], %109 {strides = array<i32>} : memref<2x8xf32, #tpu.memory_space<vmem>>, vector<2x8xf32>,
      %c0_66 = arith.constant 0 : index
      %c0_67 = arith.constant 0 : index
      %c0_68 = arith.constant 0 : index
      %111 = vector.load %arg4[%c0_66, %c0_67, %c0_68] : memref<1x8x32xf32, #tpu.memory_space<vmem>>, vector<1x8x32xf32>
      %112 = vector.shape_cast %111 : vector<1x8x32xf32> to vector<8x32xf32>
      %c0_69 = arith.constant 0 : index
      %c0_70 = arith.constant 0 : index
      %113 = vector.load %arg7[%c0_69, %c0_70] : memref<32x32xf32, #tpu.memory_space<vmem>>, vector<32x32xf32>
      %cst_71 = arith.constant dense<0.000000e+00> : vector<8x32xf32>
      %114 = tpu.matmul %112, %113, %cst_71 {dimension_numbers = #tpu.dot_dimension_numbers<[1], [0], [0], [1], [0, 0, 1, 1], [], []>} : vector<8x32xf32>, vector<32x32xf32>, vector<8x32xf32> -> vector<8x32xf32>
      %c0_72 = arith.constant 0 : index
      %c0_73 = arith.constant 0 : index
      %115 = vector.load %arg15[%c0_72, %c0_73] : memref<8x32xf32, #tpu.memory_space<vmem>>, vector<8x32xf32>
      tpu.vector_store %arg15[%c0_72, %c0_73], %114 {strides = array<i32>} : memref<8x32xf32, #tpu.memory_space<vmem>>, vector<8x32xf32>,
    } else {
    }
    %c0 = arith.constant 0 : index
    %c0_1 = arith.constant 0 : index
    %c0_2 = arith.constant 0 : index
    %3 = vector.load %arg2[%c0, %c0_1, %c0_2] : memref<1x8x32xf32, #tpu.memory_space<vmem>>, vector<1x8x32xf32>
    %4 = vector.shape_cast %3 : vector<1x8x32xf32> to vector<8x32xf32>
    %c0_3 = arith.constant 0 : index
    %c0_4 = arith.constant 0 : index
    %c0_5 = arith.constant 0 : index
    %5 = vector.load %arg5[%c0_3, %c0_4, %c0_5] : memref<1x8x8xi8, #tpu.memory_space<vmem>>, vector<1x8x8xi8>
    %6 = vector.shape_cast %5 : vector<1x8x8xi8> to vector<8x8xi8>
    %7 = arith.sitofp %6 : vector<8x8xi8> to vector<8x8xf32>
    %cst = arith.constant 1.000000e+00 : f32
    %8 = vector.broadcast %cst : f32 to vector<8x8xf32>
    %9 = arith.subf %8, %7 : vector<8x8xf32>
    %cst_6 = arith.constant 0.000000e+00 : f32
    %10 = vector.broadcast %cst_6 : f32 to vector<8x32xf32>
    %c0_7 = arith.constant 0 : index
    %c0_8 = arith.constant 0 : index
    %11 = vector.load %arg14[%c0_7, %c0_8] : memref<2x8xf32, #tpu.memory_space<vmem>>, vector<1x8xf32>
    %12 = vector.broadcast %11 : vector<1x8xf32> to vector<8x8xf32>
    %13 = arith.mulf %9, %12 : vector<8x8xf32>
    %cst_9 = arith.constant dense<0.000000e+00> : vector<8xf32>
    %14 = vector.multi_reduction <add>, %13, %cst_9 [1] : vector<8x8xf32> to vector<8xf32>
    %15 = vector.shape_cast %14 : vector<8xf32> to vector<8x1xf32>
    %cst_10 = arith.constant 0.000000e+00 : f32
    %16 = vector.broadcast %cst_10 : f32 to vector<8x1xf32>
    %17 = arith.cmpf ogt, %15, %16 : vector<8x1xf32>
    %cst_11 = arith.constant 1.000000e+00 : f32
    %18 = vector.broadcast %cst_11 : f32 to vector<8x1xf32>
    %19 = arith.select %17, %15, %18 : vector<8x1xi1>, vector<8x1xf32>
    %20 = tpu.reciprocal %19 : vector<8x1xf32> -> vector<8x1xf32>
    %cst_12 = arith.constant 0.000000e+00 : f32
    %21 = vector.broadcast %cst_12 : f32 to vector<8x1xf32>
    %22 = arith.cmpf ogt, %15, %21 : vector<8x1xf32>
    %cst_13 = arith.constant 0.000000e+00 : f32
    %cst_14 = arith.constant 1.250000e-01 : f32
    %23 = vector.broadcast %cst_13 : f32 to vector<8x1xf32>
    %24 = vector.broadcast %cst_14 : f32 to vector<8x1xf32>
    %25 = arith.select %22, %23, %24 : vector<8x1xi1>, vector<8x1xf32>
    %26 = vector.broadcast %20 : vector<8x1xf32> to vector<8x8xf32>
    %27 = arith.mulf %13, %26 : vector<8x8xf32>
    %28 = vector.broadcast %25 : vector<8x1xf32> to vector<8x8xf32>
    %29 = arith.addf %27, %28 : vector<8x8xf32>
    %c0_15 = arith.constant 0 : index
    %c0_16 = arith.constant 0 : index
    %c0_17 = arith.constant 0 : index
    %c0_18 = arith.constant 0 : index
    %30 = vector.load %arg13[%c0_15, %c0_16, %c0_17, %c0_18] : memref<2x1x8x8xf32, #tpu.memory_space<vmem>>, vector<1x1x8x8xf32>
    %31 = vector.shape_cast %30 : vector<1x1x8x8xf32> to vector<8x8xf32>
    %32 = vector.shape_cast %29 : vector<8x8xf32> to vector<1x1x8x8xf32>
    tpu.vector_store %arg13[%c0_15, %c0_16, %c0_17, %c0_18], %32 {strides = array<i32>} : memref<2x1x8x8xf32, #tpu.memory_space<vmem>>, vector<1x1x8x8xf32>,
    %c0_19 = arith.constant 0 : index
    %c0_20 = arith.constant 0 : index
    %33 = vector.load %arg15[%c0_19, %c0_20] : memref<8x32xf32, #tpu.memory_space<vmem>>, vector<8x16xf32>
    %cst_21 = arith.constant dense<0.000000e+00> : vector<8x16xf32>
    %34 = tpu.matmul %29, %33, %cst_21 {dimension_numbers = #tpu.dot_dimension_numbers<[1], [0], [0], [1], [0, 0, 1, 1], [], []>} : vector<8x8xf32>, vector<8x16xf32>, vector<8x16xf32> -> vector<8x16xf32>
    %c0_22 = arith.constant 0 : index
    %c0_23 = arith.constant 0 : index
    %35 = vector.load %arg8[%c0_22, %c0_23] : memref<32x32xf32, #tpu.memory_space<vmem>>, vector<16x32xf32>
    %cst_24 = arith.constant dense<0.000000e+00> : vector<8x32xf32>
    %36 = tpu.matmul %34, %35, %cst_24 {dimension_numbers = #tpu.dot_dimension_numbers<[1], [0], [0], [1], [0, 0, 1, 1], [], []>} : vector<8x16xf32>, vector<16x32xf32>, vector<8x32xf32> -> vector<8x32xf32>
    %37 = arith.addf %10, %36 : vector<8x32xf32>
    %c1 = arith.constant 1 : index
    %c0_25 = arith.constant 0 : index
    %38 = vector.load %arg14[%c1, %c0_25] : memref<2x8xf32, #tpu.memory_space<vmem>>, vector<1x8xf32>
    %39 = vector.broadcast %38 : vector<1x8xf32> to vector<8x8xf32>
    %40 = arith.mulf %9, %39 : vector<8x8xf32>
    %cst_26 = arith.constant dense<0.000000e+00> : vector<8xf32>
    %41 = vector.multi_reduction <add>, %40, %cst_26 [1] : vector<8x8xf32> to vector<8xf32>
    %42 = vector.shape_cast %41 : vector<8xf32> to vector<8x1xf32>
    %cst_27 = arith.constant 0.000000e+00 : f32
    %43 = vector.broadcast %cst_27 : f32 to vector<8x1xf32>
    %44 = arith.cmpf ogt, %42, %43 : vector<8x1xf32>
    %cst_28 = arith.constant 1.000000e+00 : f32
    %45 = vector.broadcast %cst_28 : f32 to vector<8x1xf32>
    %46 = arith.select %44, %42, %45 : vector<8x1xi1>, vector<8x1xf32>
    %47 = tpu.reciprocal %46 : vector<8x1xf32> -> vector<8x1xf32>
    %cst_29 = arith.constant 0.000000e+00 : f32
    %48 = vector.broadcast %cst_29 : f32 to vector<8x1xf32>
    %49 = arith.cmpf ogt, %42, %48 : vector<8x1xf32>
    %cst_30 = arith.constant 0.000000e+00 : f32
    %cst_31 = arith.constant 1.250000e-01 : f32
    %50 = vector.broadcast %cst_30 : f32 to vector<8x1xf32>
    %51 = vector.broadcast %cst_31 : f32 to vector<8x1xf32>
    %52 = arith.select %49, %50, %51 : vector<8x1xi1>, vector<8x1xf32>
    %53 = vector.broadcast %47 : vector<8x1xf32> to vector<8x8xf32>
    %54 = arith.mulf %40, %53 : vector<8x8xf32>
    %55 = vector.broadcast %52 : vector<8x1xf32> to vector<8x8xf32>
    %56 = arith.addf %54, %55 : vector<8x8xf32>
    %c1_32 = arith.constant 1 : index
    %c0_33 = arith.constant 0 : index
    %c0_34 = arith.constant 0 : index
    %c0_35 = arith.constant 0 : index
    %57 = vector.load %arg13[%c1_32, %c0_33, %c0_34, %c0_35] : memref<2x1x8x8xf32, #tpu.memory_space<vmem>>, vector<1x1x8x8xf32>
    %58 = vector.shape_cast %57 : vector<1x1x8x8xf32> to vector<8x8xf32>
    %59 = vector.shape_cast %56 : vector<8x8xf32> to vector<1x1x8x8xf32>
    tpu.vector_store %arg13[%c1_32, %c0_33, %c0_34, %c0_35], %59 {strides = array<i32>} : memref<2x1x8x8xf32, #tpu.memory_space<vmem>>, vector<1x1x8x8xf32>,
    %c0_36 = arith.constant 0 : index
    %c16 = arith.constant 16 : index
    %60 = vector.load %arg15[%c0_36, %c16] : memref<8x32xf32, #tpu.memory_space<vmem>>, vector<8x16xf32>
    %cst_37 = arith.constant dense<0.000000e+00> : vector<8x16xf32>
    %61 = tpu.matmul %56, %60, %cst_37 {dimension_numbers = #tpu.dot_dimension_numbers<[1], [0], [0], [1], [0, 0, 1, 1], [], []>} : vector<8x8xf32>, vector<8x16xf32>, vector<8x16xf32> -> vector<8x16xf32>
    %c16_38 = arith.constant 16 : index
    %c0_39 = arith.constant 0 : index
    %62 = vector.load %arg8[%c16_38, %c0_39] : memref<32x32xf32, #tpu.memory_space<vmem>>, vector<16x32xf32>
    %cst_40 = arith.constant dense<0.000000e+00> : vector<8x32xf32>
    %63 = tpu.matmul %61, %62, %cst_40 {dimension_numbers = #tpu.dot_dimension_numbers<[1], [0], [0], [1], [0, 0, 1, 1], [], []>} : vector<8x16xf32>, vector<16x32xf32>, vector<8x32xf32> -> vector<8x32xf32>
    %64 = arith.addf %37, %63 : vector<8x32xf32>
    %c0_41 = arith.constant 0 : index
    %c0_42 = arith.constant 0 : index
    %65 = vector.load %arg9[%c0_41, %c0_42] : memref<1x32xf32, #tpu.memory_space<vmem>>, vector<1x32xf32>
    %66 = vector.broadcast %65 : vector<1x32xf32> to vector<8x32xf32>
    %67 = arith.addf %64, %66 : vector<8x32xf32>
    %cst_43 = arith.constant 0.000000e+00 : f32
    %68 = vector.broadcast %cst_43 : f32 to vector<8x32xf32>
    %69 = arith.cmpf oge, %67, %68 : vector<8x32xf32>
    %cst_44 = arith.constant 2.000000e-01 : f32
    %70 = vector.broadcast %cst_44 : f32 to vector<8x32xf32>
    %71 = arith.mulf %70, %67 : vector<8x32xf32>
    %72 = arith.select %69, %67, %71 : vector<8x32xi1>, vector<8x32xf32>
    %73 = arith.addf %72, %4 : vector<8x32xf32>
    %cst_45 = arith.constant dense<0.000000e+00> : vector<8xf32>
    %74 = vector.multi_reduction <add>, %73, %cst_45 [1] : vector<8x32xf32> to vector<8xf32>
    %75 = vector.shape_cast %74 : vector<8xf32> to vector<8x1xf32>
    %cst_46 = arith.constant 3.200000e+01 : f32
    %76 = vector.broadcast %cst_46 : f32 to vector<8x1xf32>
    %77 = arith.divf %75, %76 : vector<8x1xf32>
    %78 = vector.broadcast %77 : vector<8x1xf32> to vector<8x32xf32>
    %79 = arith.subf %73, %78 : vector<8x32xf32>
    %80 = arith.mulf %79, %79 : vector<8x32xf32>
    %cst_47 = arith.constant dense<0.000000e+00> : vector<8xf32>
    %81 = vector.multi_reduction <add>, %80, %cst_47 [1] : vector<8x32xf32> to vector<8xf32>
    %82 = vector.shape_cast %81 : vector<8xf32> to vector<8x1xf32>
    %cst_48 = arith.constant 3.200000e+01 : f32
    %83 = vector.broadcast %cst_48 : f32 to vector<8x1xf32>
    %84 = arith.divf %82, %83 : vector<8x1xf32>
    %85 = vector.broadcast %77 : vector<8x1xf32> to vector<8x32xf32>
    %86 = arith.subf %73, %85 : vector<8x32xf32>
    %cst_49 = arith.constant 9.99999974E-6 : f32
    %87 = vector.broadcast %cst_49 : f32 to vector<8x1xf32>
    %88 = arith.addf %84, %87 : vector<8x1xf32>
    %89 = math.rsqrt %88 : vector<8x1xf32>
    %90 = vector.broadcast %89 : vector<8x1xf32> to vector<8x32xf32>
    %91 = arith.mulf %86, %90 : vector<8x32xf32>
    %c0_50 = arith.constant 0 : index
    %c0_51 = arith.constant 0 : index
    %92 = vector.load %arg10[%c0_50, %c0_51] : memref<1x32xf32, #tpu.memory_space<vmem>>, vector<1x32xf32>
    %93 = vector.broadcast %92 : vector<1x32xf32> to vector<8x32xf32>
    %94 = arith.mulf %91, %93 : vector<8x32xf32>
    %c0_52 = arith.constant 0 : index
    %c0_53 = arith.constant 0 : index
    %95 = vector.load %arg11[%c0_52, %c0_53] : memref<1x32xf32, #tpu.memory_space<vmem>>, vector<1x32xf32>
    %96 = vector.broadcast %95 : vector<1x32xf32> to vector<8x32xf32>
    %97 = arith.addf %94, %96 : vector<8x32xf32>
    %c0_54 = arith.constant 0 : index
    %c0_55 = arith.constant 0 : index
    %c0_56 = arith.constant 0 : index
    %98 = vector.load %arg12[%c0_54, %c0_55, %c0_56] : memref<1x8x32xf32, #tpu.memory_space<vmem>>, vector<1x8x32xf32>
    %99 = vector.shape_cast %98 : vector<1x8x32xf32> to vector<8x32xf32>
    %100 = vector.shape_cast %97 : vector<8x32xf32> to vector<1x8x32xf32>
    tpu.vector_store %arg12[%c0_54, %c0_55, %c0_56], %100 {strides = array<i32>} : memref<1x8x32xf32, #tpu.memory_space<vmem>>, vector<1x8x32xf32>,
    return
  }
  func.func @transform_0(%arg0: i32, %arg1: i32) -> (i32, i32, i32) {
    %c0_i32 = arith.constant 0 : i32
    %c0_i32_0 = arith.constant 0 : i32
    return %arg0, %arg1, %c0_i32 : i32, i32, i32
  }
  func.func @transform_1(%arg0: i32, %arg1: i32) -> (i32, i32, i32) {
    %c0_i32 = arith.constant 0 : i32
    %c0_i32_0 = arith.constant 0 : i32
    %c0_i32_1 = arith.constant 0 : i32
    return %arg0, %c0_i32, %c0_i32_0 : i32, i32, i32
  }
  func.func @transform_2(%arg0: i32, %arg1: i32) -> (i32, i32, i32) {
    %c0_i32 = arith.constant 0 : i32
    %c0_i32_0 = arith.constant 0 : i32
    %c0_i32_1 = arith.constant 0 : i32
    return %arg0, %c0_i32, %c0_i32_0 : i32, i32, i32
  }
  func.func @transform_3(%arg0: i32, %arg1: i32) -> (i32, i32, i32) {
    %c0_i32 = arith.constant 0 : i32
    %c0_i32_0 = arith.constant 0 : i32
    return %arg0, %arg1, %c0_i32 : i32, i32, i32
  }
  func.func @transform_4(%arg0: i32, %arg1: i32) -> (i32, i32) {
    %c0_i32 = arith.constant 0 : i32
    %c0_i32_0 = arith.constant 0 : i32
    %c0_i32_1 = arith.constant 0 : i32
    return %c0_i32, %c0_i32_0 : i32, i32
  }
  func.func @transform_5(%arg0: i32, %arg1: i32) -> (i32, i32) {
    %c0_i32 = arith.constant 0 : i32
    %c0_i32_0 = arith.constant 0 : i32
    %c0_i32_1 = arith.constant 0 : i32
    return %c0_i32, %c0_i32_0 : i32, i32
  }
  func.func @transform_6(%arg0: i32, %arg1: i32) -> (i32, i32) {
    %c0_i32 = arith.constant 0 : i32
    %c0_i32_0 = arith.constant 0 : i32
    %c0_i32_1 = arith.constant 0 : i32
    return %c0_i32, %c0_i32_0 : i32, i32
  }
  func.func @transform_7(%arg0: i32, %arg1: i32) -> (i32, i32) {
    %c0_i32 = arith.constant 0 : i32
    %c0_i32_0 = arith.constant 0 : i32
    %c0_i32_1 = arith.constant 0 : i32
    return %c0_i32, %c0_i32_0 : i32, i32
  }
  func.func @transform_8(%arg0: i32, %arg1: i32) -> (i32, i32) {
    %c0_i32 = arith.constant 0 : i32
    %c0_i32_0 = arith.constant 0 : i32
    %c0_i32_1 = arith.constant 0 : i32
    return %c0_i32, %c0_i32_0 : i32, i32
  }
  func.func @transform_9(%arg0: i32, %arg1: i32) -> (i32, i32) {
    %c0_i32 = arith.constant 0 : i32
    %c0_i32_0 = arith.constant 0 : i32
    %c0_i32_1 = arith.constant 0 : i32
    return %c0_i32, %c0_i32_0 : i32, i32
  }
  func.func @transform_10(%arg0: i32, %arg1: i32) -> (i32, i32, i32) {
    %c0_i32 = arith.constant 0 : i32
    %c0_i32_0 = arith.constant 0 : i32
    return %arg0, %arg1, %c0_i32 : i32, i32, i32
  }
  func.func @transform_11(%arg0: i32, %arg1: i32) -> (i32, i32, i32, i32) {
    %c0_i32 = arith.constant 0 : i32
    %c0_i32_0 = arith.constant 0 : i32
    %c0_i32_1 = arith.constant 0 : i32
    return %c0_i32, %arg0, %arg1, %c0_i32_0 : i32, i32, i32, i32
  }
}

</mosaic_0001>

<bundles_post_ra>
// kernel: map_based_mha.1
= control target key start
LH: loop header
LB: loop body
LE: loop exit
PB: predicated region body
PF: predicated region fallthrough
CT: control target
= control target key end

     0   :  { %s1819_s0 = inlined_call_operand.vmem [shape: f32[2,8,32], index: 0, kind: input, shape index: {}]   ;;  %s1820_s1 = inlined_call_operand.vmem [shape: f32[2,8,32], index: 1, kind: input, shape index: {}]   ;;  %s1821_s2 = inlined_call_operand.vmem [shape: f32[2,8,32], index: 2, kind: input, shape index: {}]   ;;  %s1822_s3 = inlined_call_operand.vmem [shape: s8[2,8,8], index: 3, kind: input, shape index: {}]   ;;  %s1823_s4 = inlined_call_operand.vmem [shape: f32[2,32], index: 4, kind: input, shape index: {}]   ;;  %s1824_s5 = inlined_call_operand.vmem [shape: f32[32,32], index: 5, kind: input, shape index: {}]   ;;  %s1825_s6 = inlined_call_operand.vmem [shape: f32[32,32], index: 6, kind: input, shape index: {}]   ;;  %s1826_s7 = inlined_call_operand.vmem [shape: f32[1,32], index: 7, kind: input, shape index: {}]   ;;  %s1827_s8 = inlined_call_operand.vmem [shape: f32[1,32], index: 8, kind: input, shape index: {}]   ;;  %s1828_s9 = inlined_call_operand.vmem [shape: f32[1,32], index: 9, kind: input, shape index: {}]   ;;  %s1829_s10 = inlined_call_operand.hbm [shape: f32[2,8,32], index: 10, kind: output, shape index: {0}]   ;;  %s1830_s11 = inlined_call_operand.hbm [shape: f32[2,2,8,8], index: 11, kind: output, shape index: {1}]  }
   0x1   :  { %1832 = sst [smem:[#allocation10_spill]] %s1819_s0 }
   0x2   :  { %1833 = sst [smem:[#allocation11_spill]] %s1820_s1 }
   0x3   :  { %1834 = sst [smem:[#allocation12_spill]] %s1821_s2 }
   0x4   :  { %1835 = sst [smem:[#allocation13_spill]] %s1822_s3 }
   0x5   :  { %1836 = sst [smem:[#allocation14_spill]] %s1824_s5 }
   0x6   :  { %17 = vsyncpa [#allocation5], 0 }
   0x7   :  { %19 = vsyncpa [#allocation5 + $0x1], 0 }
   0x8   :  { %20 = vsyncpa [#allocation7], 0 }
   0x9   :  { %22 = vsyncpa [#allocation7 + $0x1], 0  ;;  %s1574_s17 = smov 0   ;;  %s1576_s18 = smov 0  }
   0xa   :  { %s1578_s19 = smov 0   ;;  %s1580_s20 = smov 0  }
   0xb   :  { %s1582_s21 = smov 0   ;;  %s1584_s22 = smov 0  }
   0xc LB: > { %s1217_s23 = sadd.s32 4294967295, %s1502_s22   ;;  %s1218_s24 = sadd.s32 4294967294, %s1502_s22   ;;  %s1502_s22 = sphi %s1584_s22, %s28_s22   ;;  %s1498_s21 = sphi %s1582_s21, %s1849_s21   ;;  %s1494_s20 = sphi %s1580_s20, %s1848_s20   ;;  %s1490_s19 = sphi %s1578_s19, %s1847_s19   ;;  %s1486_s18 = sphi %s1576_s18, %s1846_s18   ;;  %s1482_s17 = sphi %s1574_s17, %s1845_s17  }
   0xd   : > { %s40_s25 = sadd.s32 1, %s1498_s21  ;;  %s283_s26 = sadd.s32 1, %s1490_s19 }
   0xe   : > { %p42_p0 = scmp.ge.s32.totalorder %s40_s25, 2  ;;  %p293_p1 = scmp.ne.s32.totalorder %s1490_s19, %s1486_s18 }
   0xf   : > { %p294_p2 = scmp.eq.s32.totalorder %s1217_s23, 1  ;;  %p299_p3 = scmp.ne.s32.totalorder %s1486_s18, %s1482_s17 }
  0x10   : > { %s1851_s25 = smov (%p42_p0, %s40_s25), 0  ;;  %p300_p5 = scmp.eq.s32.totalorder %s1218_s24, 1 }
  0x11   : > { %p1614_p4 = por %p294_p2, %p293_p1  ;;  %s278_s28 = ssub.s32 %s1498_s21, %s1851_s25 }
  0x12   : > { %p1221_p6 = scmp.ge.s32.totalorder %s1502_s22, 1  ;;  %p281_p7 = scmp.eq.s32.totalorder %s278_s28, 0 }
  0x13   : > { %p1621_p8 = por %p300_p5, %p299_p3  ;;  %p398_p9 = scmp.lt.s32.totalorder %s1502_s22, 3 }
  0x14   : > { %s1627_s30 = scalar_select %p281_p7, %s1490_s19, %s283_s26  }
  0x15   : > { %p399_p10 = pnand %p1221_p6, %p398_p9 }
  0x16   : > { %p460_p11 = scmp.lt.s32.totalorder (!%p399_p10), %s1494_s20, 1  ;;  %v1504_v0 = vmov (!%p399_p10), 0.0   ;;  %vm1505_vm0 = vmmov (!%p399_p10), 0   ;;  %s1839_s5 = sld [smem:[#allocation14_spill]] (!%p399_p10)  ;;  %v1506_v4 = vmov (!%p399_p10), 0.0|0.0   ;;  %vm488_vm1 = vcmask (!%p399_p10), 261120  }
  0x17   : > { %402 = sbr.rel (%p399_p10) target bundleno = 1343 (0x53f), region = 60  ;;  %1264 = vmatprep.subr.mxu0 (!%p399_p10), %v1504_v0  ;;  %1266 = vmatprep.mubr.msk.f32.mxu0 (!%p399_p10), %vm1505_vm0, %v1504_v0  ;;  %s1840_s1 = sld [smem:[#allocation11_spill]] (!%p399_p10)  ;;  %v487_v9 = vld [vmem:[%s1823_s4] sm:$0x3] (!%p399_p10)  ;;  %vm565_vm2 = vcmask (!%p399_p10), 58368   ;;  %vm663_vm3 = vcmask (!%p399_p10), 64512  }
  0x18   : > { %1304 = vmatprep.subr.bf16.mxu1 (!%p399_p10), %v1506_v4  ;;  %1277 = vmatprep.mubr.msk.f32.mxu1 (!%p399_p10), %vm1505_vm0, %v1504_v0  ;;  %s1841_s2 = sld [smem:[#allocation12_spill]] (!%p399_p10)  ;;  %s1842_s3 = sld [smem:[#allocation13_spill]] (!%p399_p10)  ;;  %v1508_v38 = vmov (!%p399_p10), 0.125   ;;  %v748_v45 = vld [vmem:[%s1825_s6] sm:$0xff] (!%p399_p10)  ;;  %v749_v46 = vld [vmem:[%s1825_s6 + $0x8] sm:$0xff] (!%p399_p10)  ;;  %v845_v48 = vld [vmem:[%s1825_s6 + $0x10] sm:$0xff] (!%p399_p10) }
  0x19   : > { %s1686_s16 = sand.u32 (!%p399_p10), 1, %s1486_s18   ;;  %v1314_v47 = vpack.c.bf16 (!%p399_p10), %v749_v46, %v748_v45  ;;  %v846_v49 = vld [vmem:[%s1825_s6 + $0x18] sm:$0xff] (!%p399_p10)  ;;  %vm847_vm6 = vcmask (!%p399_p10), 130048   ;;  %v1238_v58 = vld [vmem:[%s1826_s7] ss:$0 sm:$0xff] (!%p399_p10)  ;;  %s1843_s0 = sld [smem:[#allocation10_spill]] (!%p399_p10) }
  0x1a   : > { %s1223_s23 = sshll.u32 (!%p399_p10), %s1686_s16, 4  ;;  %v1311_v50 = vpack.c.bf16 (!%p399_p10), %v846_v49, %v845_v48  ;;  %s1044_s13 = scalar_lea.sflag (!%p399_p10), [#allocation7], %s1686_s16 }
  0x1b   : > { %s1695_s14 = scalar_lea.vmem (!%p399_p10), [#allocation6], %s1223_s23 }
  0x1c   : > { %v574_v1 = vld [vmem:[%s1839_s5] sm:$0xff] (!%p399_p10)  ;;  %v575_v2 = vld [vmem:[%s1839_s5 + $0x8] sm:$0xff] (!%p399_p10)  ;;  %v576_v3 = vld [vmem:[%s1839_s5 + $0x10] sm:$0xff] (!%p399_p10) }
  0x1d   : > { %v1305_v5 = vpack.c.bf16 (!%p399_p10), %v575_v2, %v574_v1  ;;  %v577_v6 = vld [vmem:[%s1839_s5 + $0x18] sm:$0xff] (!%p399_p10) }
  0x1e   : > { %s1643_s24 = scalar_select %p460_p11, %s1494_s20, 1  ;;  %v1308_v7 = vpack.c.bf16 %v577_v6, %v576_v3 }
  0x1f   : > { %1306 = vmatpush3.bf16.msra.mxu1 %v1305_v5 }
  0x20   : > { %s1652_s12 = sshll.u32 %s1643_s24, 3  ;;  %1307 = vmatprep.subr.bf16.mxu1 %v1506_v4  ;;  %s1227_s5 = sshll.u32 %s1643_s24, 1 }
  0x21   : > { %s470_s15 = scalar_lea.vmem %s1840_s1, %s1652_s12  ;;  %s474_s26 = scalar_lea.vmem %s1841_s2, %s1652_s12 }
  0x22   : > { %v486_v8 = vld [vmem:[%s470_s15] sm:$0xff]  ;;  %s481_s15 = scalar_lea.vmem %s1842_s3, %s1227_s5  ;;  %s1507_s24 = smov 112  }
  0x23   : > { %1265 = vmatpush3.xpose.msk.msra.mxu0 %vm488_vm1, %v486_v8  ;;  %1309 = vmatpush3.bf16.msra.mxu1 %v1308_v7  ;;  %v573_v10 = vld [vmem:[%s474_s26] sm:$0xff]  ;;  %s1071_s5 = sshll.u32 %s1695_s14, 4  ;;  %s1732_s5 = int_to_ptr.vmem [resolvable:$true] %s1071_s5 }
  0x24   : > { %1280 = vmatprep.subr.mxu0 %v1504_v0  ;;  %1310 = vmatprep.subr.bf16.mxu1 %v1506_v4  ;;  %v653_v20 = vld [vmem:[%s481_s15] sm:$0x3]  ;;  %s1392_s15 = scalar_lea.vmem %s1732_s5, 256 }
  0x25   : > { %v654_v21 = vunpack.c.0.s8 %v653_v20  ;;  %p1393_p12 = scmp.ne.s32.totalorder %s1732_s5, %s1392_s15 }
  0x26   : > { %1267 = vmatmul.mubr.msk.f32.vlgmr.msra.gmra.mrb[0].mxu0 %vm488_vm1, %v487_v9  ;;  %1278 = vmatmul.mubr.msk.f32.vlgmr.msra.gmra.mrb[0].mxu1 %vm488_vm1, %v573_v10 }
  0x27   : > { %1282 = vmatprep.mubr.msk.f32.mxu0 %vm1505_vm0, %v1504_v0  ;;  %1294 = vmatprep.mubr.msk.f32.mxu1 %vm1505_vm0, %v1504_v0  ;;  %v655_v23 = vcvt.s32.f32 %v654_v21  ;;  %p1394_p13 = pnand %p1393_p12, %p1614_p4 }
  0x28   : > { %1312 = vmatpush3.bf16.msra.mxu1 %v1311_v50 }
  0x29   : > { %v656_v24 = vsub.f32 1.0, %v655_v23  ;;  %p1395_p0 = pneg %p1394_p13 }
  0xf9   : > { %v561_v11 = vpop.f32.mrb[0].mxu0  ;;  %v647_v14 = vpop.f32.mrb[0].mxu1 }
  0xfa   : > { %v1268_v12 = vpop.f32.mrb[1].mxu0  ;;  %v566_v13 = vsel %vm565_vm2, %v561_v11, -inf  ;;  %651 = vst.msk [vmem:[#allocation3] sm:$0xff] %vm488_vm1, %v647_v14  ;;  %v1279_v15 = vpop.f32.mrb[1].mxu1 }
  0xfb   : > { %567 = vmax.xlane.f32.xlu0 %v566_v13 }
 0x101   : > { %v674_v16 = vld [vmem:[#allocation3] sm:$0xff] }
 0x102   : > { %1281 = vmatpush3.msra.mxu0 %v674_v16 }
 0x103   : > { %1285 = vmatprep.subr.mxu0 %v1504_v0 }
 0x188   : > { %v568_v17 = vpop.xlane.xlu0 %567 }
 0x189   : > { %v569_v18 = vsub.f32 %v561_v11, %v568_v17 }
 0x18b   : > { %v570_v19 = vmul.f32 1.442695, %v569_v18 }
 0x18d   : > { %1384 = vpow2.f32 %v570_v19 }
 0x197   : > { %v1385_v22 = vpop.eup %1384 }
 0x198   : > { %572 = vst.msk [vmem:[#allocation2] sm:$0x3] %vm565_vm2, %v1385_v22 }
 0x19f   : > { %v1233_v25 = vld [vmem:[#allocation2 + $0x1] ss:$0 sm:$0xff]  ;;  %v1231_v26 = vld [vmem:[#allocation2] ss:$0 sm:$0xff] }
 0x1a0   : > { %v755_v27 = vmul.f32 %v1233_v25, %v656_v24  ;;  %v662_v28 = vmul.f32 %v1231_v26, %v656_v24 }
 0x1a2   : > { %v756_v29 = vsel %vm663_vm3, %v755_v27, 0.0  ;;  %v664_v30 = vsel %vm663_vm3, %v662_v28, 0.0 }
 0x1a3   : > { %757 = vadd.xlane.f32.xlu1 %v756_v29  ;;  %665 = vadd.xlane.f32.xlu0 %v664_v30 }
 0x1b4   : > { %769 = vrot.lane.b32.xlu1 %v674_v16, %s1507_s24  ;;  %s466_s24 = scalar_lea.vmem %s1843_s0, %s1652_s12  ;;  %s1831_s12 = sshll.u32 %s1494_s20, 7 }
 0x1b5   : > { %v652_v63 = vld [vmem:[%s466_s24] sm:$0xff]  ;;  %s1729_s28 = scalar_lea.hbm %s1830_s11, %s1831_s12  ;;  %s1509_s24 = smov [#allocation6]  }
 0x1b6   : > { %s1396_s0 = sshll.u32 %s1509_s24, 4  ;;  %s1397_s0 = int_to_ptr.vmem [resolvable:$false] %s1396_s0 }
 0x1b7   : > { %s1398_s1 = scalar_lea.vmem %s1397_s0, 512  ;;  %p1399_p1 = scmp.lt.s32.totalorder %s1732_s5, %s1397_s0 }
 0x1b8   : > { %p1400_p2 = scmp.lt.s32.totalorder %s1398_s1, %s1392_s15 }
 0x1ba   : > { %p1401_p3 = por %p1400_p2, %p1399_p1 }
 0x1bc   : > { %p1402_p5 = pnand %p1401_p3, %p1395_p0 }
 0x230   : > { %v758_v31 = vpop.xlane.xlu1 %757  ;;  %v666_v32 = vpop.xlane.xlu0 %665 }
 0x231   : > { %vm759_vm4 = vcmp.gt.f32.partialorder %v758_v31, 0.0  ;;  %vm667_vm5 = vcmp.gt.f32.partialorder %v666_v32, 0.0 }
 0x232   : > { %v760_v33 = vsel %vm759_vm4, %v758_v31, 1.0  ;;  %v668_v34 = vsel %vm667_vm5, %v666_v32, 1.0  ;;  %v762_v39 = vsel %vm759_vm4, 0.0, %v1508_v38  ;;  %v670_v42 = vsel %vm667_vm5, 0.0, %v1508_v38 }
 0x233   : > { %1386 = vrcp.f32 %v760_v33 }
 0x234   : > { %1388 = vrcp.f32 %v668_v34  ;;  %v770_v44 = vpop.permute.xlu1 %769 }
 0x23d   : > { %v1387_v35 = vpop.eup %1386 }
 0x23e   : > { %v1389_v36 = vpop.eup %1388  ;;  %v763_v37 = vmul.f32 %v1387_v35, %v755_v27 }
 0x23f   : > { %v671_v40 = vmul.f32 %v1389_v36, %v662_v28 }
 0x240   : > { %v764_v41 = vadd.f32 %v763_v37, %v762_v39 }
 0x241   : > { %v672_v43 = vadd.f32 %v671_v40, %v670_v42 }
 0x242   : > { %1234 = vst.msk [vmem:[%s1695_s14 + $0x8] sm:$0xff] %vm663_vm3, %v764_v41 }
 0x243   : > { %1283 = vmatmul.mubr.msk.f32.vlgmr.msra.gmra.mrb[2].mxu0 %vm663_vm3, %v672_v43  ;;  %673 = vst.msk [vmem:[%s1695_s14] sm:$0xff] %vm663_vm3, %v672_v43 }
 0x244   : > { %1286 = vmatpush3.msra.mxu0 %v770_v44  ;;  %1287 = vmatprep.mubr.msk.f32.mxu0 %vm1505_vm0, %v1504_v0 }
 0x245   : > { %1313 = vmatprep.subr.bf16.mxu0 %v1506_v4 }
 0x247   : > { %1288 = vmatmul.mubr.msk.f32.vlgmr.msra.gmra.mrb[4].mxu0 %vm663_vm3, %v764_v41 }
 0x248   : > { %1315 = vmatpush3.bf16.msra.mxu0 %v1314_v47  ;;  %1301 = vmatprep.mubr.msk.f32.mxu0 %vm1505_vm0, %v1504_v0 }
 0x316   : > { %v744_v51 = vpop.f32.mrb[2].mxu0 }
 0x317   : > { %v1284_v52 = vpop.f32.mrb[3].mxu0  ;;  %1302 = vmatmul.mubr.msk.f32.vlgmr.msra.gmra.mrb[6].mxu0 %vm847_vm6, %v744_v51 }
 0x31a   : > { %v841_v53 = vpop.f32.mrb[4].mxu0 }
 0x31b   : > { %v1289_v54 = vpop.f32.mrb[5].mxu0  ;;  %1295 = vmatmul.mubr.msk.f32.vlgmr.msra.gmra.mrb[2].mxu1 %vm847_vm6, %v841_v53 }
 0x3ea   : > { %v990_v55 = vpop.f32.mrb[6].mxu0 }
 0x3eb   : > { %v1303_v56 = vpop.f32.mrb[7].mxu0 }
 0x3ee   : > { %v917_v57 = vpop.f32.mrb[2].mxu1 }
 0x3ef   : > { %v991_v59 = vadd.f32 %v990_v55, %v917_v57  ;;  %v1296_v60 = vpop.f32.mrb[3].mxu1 }
 0x3f1   : > { %v1001_v61 = vadd.f32 %v1238_v58, %v991_v59 }
 0x3f3   : > { %v1003_v62 = vmul.f32 0.2, %v1001_v61  ;;  %vm1002_vm7 = vcmp.ge.f32.partialorder %v1001_v61, 0.0 }
 0x3f5   : > { %v1004_v0 = vsel %vm1002_vm7, %v1001_v61, %v1003_v62 }
 0x3f6   : > { %v1005_v1 = vadd.f32 %v1004_v0, %v652_v63 }
 0x3f8   : > { %v1007_v2 = vsel %vm488_vm1, %v1005_v1, 0.0 }
 0x3f9   : > { %1008 = vadd.xlane.f32.xlu0 %v1007_v2 }
 0x486   : > { %v1009_v3 = vpop.xlane.xlu0 %1008 }
 0x487   : > { %v1011_v4 = vmul.f32 0.03125, %v1009_v3 }
 0x489   : > { %v1012_v5 = vsub.f32 %v1005_v1, %v1011_v4 }
 0x48b   : > { %v1013_v6 = vmul.f32 %v1012_v5, %v1012_v5 }
 0x48d   : > { %v1014_v7 = vsel %vm488_vm1, %v1013_v6, 0.0 }
 0x48e   : > { %1015 = vadd.xlane.f32.xlu0 %v1014_v7 }
 0x48f   : > { %1405 = shalt.err (!%p1402_p5)
}
 0x490   : > { %s1406_s14 = scalar_lea.hbm %s1729_s28, 256  ;;  %s1410_s24 = scalar_lea.hbm %s1830_s11, 512 }
 0x491   : > { %p1407_p6 = scmp.ne.s32.totalorder %s1729_s28, %s1406_s14  ;;  %p1411_p10 = scmp.lt.u32.totalorder %s1729_s28, %s1830_s11 }
 0x492   : > { %p1412_p11 = scmp.lt.u32.totalorder %s1410_s24, %s1406_s14  ;;  %p1414_p13 = scmp.lt.u32.totalorder %s1406_s14, %s1729_s28 }
 0x493   : > { %p1408_p7 = pnand %p1407_p6, %p1614_p4 }
 0x494   : > { %p1413_p12 = por %p1412_p11, %p1411_p10 }
 0x495   : > { %p1409_p9 = pneg %p1408_p7 }
 0x496   : > { %p1415_p0 = por %p1414_p13, %p1413_p12 }
 0x498   : > { %p1416_p1 = pnand %p1415_p0, %p1409_p9 }
 0x49a   : > { %1419 = shalt.err (!%p1416_p1)
}
 0x49b   : > { %s1510_s1 = smov 128   ;;  %s1511_s15 = smov 256   ;;  %v1239_v12 = vld [vmem:[%s1827_s8] ss:$0 sm:$0xff] }
 0x49c   : > { %s1512_s23 = smov 8   ;;  %s1222_s12 = sshll.u32 %s1686_s16, 3  ;;  %v1240_v14 = vld [vmem:[%s1828_s9] ss:$0 sm:$0xff] }
 0x49d   : > { %1317 = dma.vmem_to_hbm [thread:$0]  (%p1614_p4), %s1732_s5, 256, %s1729_s28, %s1044_s13, %s1510_s1, %s1511_s15, %s1512_s23  }
 0x49e   : > { %s452_s2 = scalar_lea.vmem [#allocation4], %s1222_s12  ;;  %s1844_s28 = sshll.u32 %s1494_s20, 7 }
 0x49f   : > { %s1058_s3 = sshll.u32 %s452_s2, 4  ;;  %s1770_s1 = scalar_lea.hbm %s1829_s10, %s1844_s28  ;;  %s1772_s3 = int_to_ptr.vmem [resolvable:$true] %s1058_s3 }
 0x4a0   : > { %s1039_s15 = scalar_lea.sflag [#allocation5], %s1686_s16  ;;  %s1420_s23 = scalar_lea.vmem %s1772_s3, 128 }
 0x4a1   : > { %p1421_p2 = scmp.ne.s32.totalorder %s1772_s3, %s1420_s23  ;;  %s1513_s12 = smov [#allocation4]  }
 0x4a2   : > { %s1424_s20 = sshll.u32 %s1513_s12, 4  ;;  %s1425_s20 = int_to_ptr.vmem [resolvable:$false] %s1424_s20 }
 0x4a3   : > { %p1422_p3 = pnand %p1421_p2, %p1614_p4  ;;  %s1426_s14 = scalar_lea.vmem %s1425_s20, 256 }
 0x4a4   : > { %p1427_p6 = scmp.lt.s32.totalorder %s1772_s3, %s1425_s20  ;;  %p1428_p7 = scmp.lt.s32.totalorder %s1426_s14, %s1420_s23 }
 0x4a5   : > { %p1423_p5 = pneg %p1422_p3 }
 0x4a6   : > { %p1429_p9 = por %p1428_p7, %p1427_p6 }
 0x4a8   : > { %p1430_p10 = pnand %p1429_p9, %p1423_p5 }
 0x51b   : > { %v1016_v8 = vpop.xlane.xlu0 %1015 }
 0x51c   : > { %v1017_v9 = vmul.f32 0.03125, %v1016_v8 }
 0x51e   : > { %v1018_v10 = vadd.f32 1e-05, %v1017_v9 }
 0x520   : > { %1390 = vrsqrt.f32 %v1018_v10 }
 0x52a   : > { %v1391_v11 = vpop.eup %1390 }
 0x52b   : > { %v1020_v13 = vmul.f32 %v1391_v11, %v1012_v5 }
 0x52d   : > { %v1028_v15 = vmul.f32 %v1239_v12, %v1020_v13 }
 0x52f   : > { %v1036_v16 = vadd.f32 %v1240_v14, %v1028_v15 }
 0x531   : > { %1037 = vst.msk [vmem:[%s452_s2] sm:$0xff] %vm488_vm1, %v1036_v16 }
 0x532   : > { %1433 = shalt.err (!%p1430_p10)
}
 0x533   : > { %s1434_s2 = scalar_lea.hbm %s1770_s1, 128  ;;  %s1438_s24 = scalar_lea.hbm %s1829_s10, 256 }
 0x534   : > { %p1435_p11 = scmp.ne.s32.totalorder %s1770_s1, %s1434_s2  ;;  %p1439_p0 = scmp.lt.u32.totalorder %s1770_s1, %s1829_s10 }
 0x535   : > { %p1440_p1 = scmp.lt.u32.totalorder %s1438_s24, %s1434_s2  ;;  %p1442_p3 = scmp.lt.u32.totalorder %s1434_s2, %s1770_s1 }
 0x536   : > { %p1436_p12 = pnand %p1435_p11, %p1614_p4 }
 0x537   : > { %p1441_p2 = por %p1440_p1, %p1439_p0 }
 0x538   : > { %p1437_p13 = pneg %p1436_p12 }
 0x539   : > { %p1443_p5 = por %p1442_p3, %p1441_p2 }
 0x53b   : > { %p1444_p6 = pnand %p1443_p5, %p1437_p13 }
 0x53d   : > { %1447 = shalt.err (!%p1444_p6)
}
 0x53e   : > { %1316 = dma.vmem_to_hbm [thread:$0]  (%p1614_p4), %s1772_s3, 128, %s1770_s1, %s1039_s15  }
 0x53f PF: > { %p1327_p7 = scmp.ge.s32.totalorder %s1502_s22, 2  ;;  %s1086_s5 = sand.u32 1, %s1482_s17  }
 0x540   : > { %s1087_s13 = scalar_lea.sflag [#allocation5], %s1086_s5 }
 0x541   : > { %p1321_p9 = pnand %p1327_p7, %p1621_p8 }
 0x543   : > { %1473 = dma.done.wait (!%p1321_p9), %s1087_s13, 128  }
 0x544   : > { %1475 = vsyncadd (!%p1321_p9), %s1087_s13, 4294967168  ;;  %s1096_s23 = scalar_lea.sflag [#allocation7], %s1086_s5 }
 0x545   : > { %1477 = dma.done.wait (!%p1321_p9), %s1096_s23, 256  }
 0x546   : > { %1479 = vsyncadd (!%p1321_p9), %s1096_s23, 4294967040  ;;  %s28_s22 = sadd.s32 1, %s1502_s22   ;;  %s1845_s17 = smov %s1486_s18 }
 0x547   : > { %p25_p10 = scmp.ge.s32.totalorder %s28_s22, 4   ;;  %s1846_s18 = smov %s1490_s19 }
 0x548   : > { %s1847_s19 = smov %s1627_s30  ;;  %s1848_s20 = smov %s1498_s21 }
 0x549   : > { %s1849_s21 = smov %s1851_s25  ;;  %27 = sbr.rel (!%p25_p10) target bundleno = 12 (0xc), region = 126 }
 0x550   :  { %1101 = vsyncpa [#allocation5], 1 }
 0x551   :  { %1103 = vsyncpa [#allocation5 + $0x1], 1 }
 0x552   :  { %1104 = vsyncpa [#allocation7], 1 }
 0x553   :  { %1106 = vsyncpa [#allocation7 + $0x1], 1 }

</bundles_post_ra>
